<compile_context>
chip_gen: v5e
topology: v5e:2x2
jax: 0.10.0
libtpu: 0.0.40
codegen_flags: <defaults>
</compile_context>

<pallas_src>
import math
from functools import partial

import jax
import jax.numpy as jnp
from jax.experimental import pallas as pl
from jax.experimental.pallas import tpu as pltpu


def _round_up(a: int, b: int) -> int:
    return (a + b - 1) // b * b


# ---------------------------------------------------------------------------
# Kernel
# ---------------------------------------------------------------------------
def _mlp_kernel(x_ref, w1_ref, b1_ref, w2_ref, b2_ref, o_ref):
    # Layer 1: bf16 MXU matmul with f32 accumulation; bias + ReLU in f32.
    h = jnp.dot(x_ref[...], w1_ref[...], preferred_element_type=jnp.float32)
    h = jnp.maximum(h + b1_ref[...], 0.0)          # (tm, H) + (1, H) broadcast

    # Layer 2: cast hidden back to bf16 for the MXU, f32 accumulate again.
    y = jnp.dot(h.astype(jnp.bfloat16), w2_ref[...],
                preferred_element_type=jnp.float32)
    y = jnp.maximum(y + b2_ref[...], 0.0)          # (tm, O) + (1, O) broadcast

    o_ref[...] = y.astype(o_ref.dtype)


# ---------------------------------------------------------------------------
# Wrapper
# ---------------------------------------------------------------------------
@partial(jax.jit, static_argnames=("block_m",))
def mlp_forward(x, w1, b1, w2, b2, *, block_m=512):
    """x: (B, I); w1: (I, H); b1: (1, H); w2: (H, O); b2: (1, O) -> (B, O)."""
    B, I = x.shape
    H = w1.shape[1]
    O = w2.shape[1]
    assert w1.shape == (I, H) and b1.shape == (1, H)
    assert w2.shape == (H, O) and b2.shape == (1, O)

    out_dtype = x.dtype

    # bf16 operands for the MXU (f32 accumulate inside the kernel). In a real
    # model the weights would be stored in bf16 already; the casts here are
    # no-ops in that case.
    xb = x.astype(jnp.bfloat16)
    w1b = w1.astype(jnp.bfloat16)
    w2b = w2.astype(jnp.bfloat16)
    b1f = b1.astype(jnp.float32)
    b2f = b2.astype(jnp.float32)

    # ---- Row-tile size -----------------------------------------------------
    # Small batches: one full-array block (no (8,128) constraint, no padding).
    # Larger batches: 16-aligned tiles (bf16 sublane packing), capped at
    # block_m, and at least 2 grid steps so v7x megacore can shard rows.
    if B <= 16:
        tm = B
    else:
        tm = min(block_m, _round_up(B, 16))
        if pl.cdiv(B, tm) < 2:
            tm = max(16, _round_up(pl.cdiv(B, 2), 16))
    n_blocks = pl.cdiv(B, tm)
    B_pad = n_blocks * tm
    if B_pad != B:
        # Only pad the batch when B doesn't divide into the chosen tile; the
        # padded rows are sliced off below.
        xb = jnp.pad(xb, ((0, B_pad - B), (0, 0)))

    # ---- VMEM budget / cost hints -------------------------------------------
    out_isz = jnp.dtype(out_dtype).itemsize
    vmem_bytes = (
        2 * tm * I * 2          # x tile, double-buffered, bf16
        + I * H * 2             # W1, single-buffered, bf16
        + H * O * 2             # W2, single-buffered, bf16
        + (H + O) * 4           # biases, f32
        + 2 * tm * O * out_isz  # output tile, double-buffered
        + tm * H * 4            # hidden activation in f32 (register/VMEM temps)
        + tm * O * 4            # f32 output temp before cast
    )
    vmem_limit = int(min(max(2 * vmem_bytes, 32 << 20), 64 << 20))

    cost = pl.CostEstimate(
        flops=2 * B_pad * (I * H + H * O),
        transcendentals=0,
        bytes_accessed=(B_pad * I * 2 + I * H * 2 + H * O * 2
                        + (H + O) * 4 + B_pad * O * out_isz),
    )

    grid_spec = pltpu.PrefetchScalarGridSpec(
        num_scalar_prefetch=0,
        grid=(n_blocks,),
        in_specs=[
            # Streamed row tile of the input (double-buffered by default).
            pl.BlockSpec((tm, I), lambda i: (i, 0)),
            # Constant operands: resident in VMEM, single-buffered.
            pl.BlockSpec((I, H), lambda i: (0, 0), pipeline_mode=pl.Buffered(1)),
            pl.BlockSpec((1, H), lambda i: (0, 0), pipeline_mode=pl.Buffered(1)),
            pl.BlockSpec((H, O), lambda i: (0, 0), pipeline_mode=pl.Buffered(1)),
            pl.BlockSpec((1, O), lambda i: (0, 0), pipeline_mode=pl.Buffered(1)),
        ],
        out_specs=pl.BlockSpec((tm, O), lambda i: (i, 0)),
    )

    out = pl.pallas_call(
        _mlp_kernel,
        out_shape=jax.ShapeDtypeStruct((B_pad, O), out_dtype),
        grid_spec=grid_spec,
        compiler_params=pltpu.CompilerParams(
            dimension_semantics=("parallel",),   # megacore sharding on v7x
            vmem_limit_bytes=vmem_limit,
        ),
        cost_estimate=cost,
    )(xb, w1b, b1f, w2b, b2f)

    return out[:B] if B_pad != B else out


# ---------------------------------------------------------------------------
# Deterministic parameter init (mirrors the PyTorch _init_weights):
#   Linear weights: xavier_normal_, biases: 0.
#   Stored pre-transposed as (in, out) so the kernel computes x @ W.
# ---------------------------------------------------------------------------
def init_mlp_params(key, input_size, hidden_size, output_size, dtype=jnp.float32):
    k1, k2 = jax.random.split(key)
    std1 = math.sqrt(2.0 / (input_size + hidden_size))
    std2 = math.sqrt(2.0 / (hidden_size + output_size))
    w1 = (jax.random.normal(k1, (input_size, hidden_size), jnp.float32) * std1).astype(dtype)
    b1 = jnp.zeros((1, hidden_size), dtype)
    w2 = (jax.random.normal(k2, (hidden_size, output_size), jnp.float32) * std2).astype(dtype)
    b2 = jnp.zeros((1, output_size), dtype)
    return w1, b1, w2, b2


# ---------------------------------------------------------------------------
# Demo / self-check
# ---------------------------------------------------------------------------
if __name__ == "__main__":
    # Small shapes consistent with the module.
    batch, input_size, hidden_size, output_size = 8, 32, 64, 16

    key = jax.random.PRNGKey(0)
    kx, kp = jax.random.split(key)

    x = jax.random.normal(kx, (batch, input_size), dtype=jnp.float32)
    w1, b1, w2, b2 = init_mlp_params(kp, input_size, hidden_size, output_size)

    out = mlp_forward(x, w1, b1, w2, b2)
    out = jax.block_until_ready(out)

    # Plain-JAX f32 reference of the PyTorch forward:
    #   x -> Linear -> ReLU -> Linear -> ReLU
    h_ref = jnp.maximum(x @ w1 + b1, 0.0)
    y_ref = jnp.maximum(h_ref @ w2 + b2, 0.0)

    assert out.shape == (batch, output_size)
    # bf16 MXU operands with f32 accumulation -> bf16-level numerics.
    assert jnp.allclose(out, y_ref, atol=3e-2, rtol=3e-2), (
        float(jnp.max(jnp.abs(out - y_ref))))

    print("KERNEL_OK")
</pallas_src>

<mosaic_0001>
module attributes {stable_mosaic.version = 11 : i64} {
  func.func @_mlp_kernel(%arg0: i32, %arg1: memref<8x32xbf16, #tpu.memory_space<vmem>>, %arg2: memref<32x64xbf16, #tpu.memory_space<vmem>>, %arg3: memref<1x64xf32, #tpu.memory_space<vmem>>, %arg4: memref<64x16xbf16, #tpu.memory_space<vmem>>, %arg5: memref<1x16xf32, #tpu.memory_space<vmem>>, %arg6: memref<8x16xf32, #tpu.memory_space<vmem>>) attributes {dimension_semantics = [#tpu.dimension_semantics<parallel>], iteration_bounds = array<i64: 1>, scalar_prefetch = 0 : i64, scratch_operands = 0 : i64, tpu.core_type = #tpu.core_type<tc>, window_params = [{transform_indices = @transform_0, window_bounds = array<i64: 8, 32>}, {pipeline_mode = #tpu.pipeline_mode<synchronous>, transform_indices = @transform_1, window_bounds = array<i64: 32, 64>}, {pipeline_mode = #tpu.pipeline_mode<synchronous>, transform_indices = @transform_2, window_bounds = array<i64: 1, 64>}, {pipeline_mode = #tpu.pipeline_mode<synchronous>, transform_indices = @transform_3, window_bounds = array<i64: 64, 16>}, {pipeline_mode = #tpu.pipeline_mode<synchronous>, transform_indices = @transform_4, window_bounds = array<i64: 1, 16>}, {transform_indices = @transform_5, window_bounds = array<i64: 8, 16>}]} {
    %c0 = arith.constant 0 : index
    %c0_0 = arith.constant 0 : index
    %0 = vector.load %arg1[%c0, %c0_0] : memref<8x32xbf16, #tpu.memory_space<vmem>>, vector<8x32xbf16>
    %c0_1 = arith.constant 0 : index
    %c0_2 = arith.constant 0 : index
    %1 = vector.load %arg2[%c0_1, %c0_2] : memref<32x64xbf16, #tpu.memory_space<vmem>>, vector<32x64xbf16>
    %cst = arith.constant dense<0.000000e+00> : vector<8x64xf32>
    %2 = tpu.matmul %0, %1, %cst {dimension_numbers = #tpu.dot_dimension_numbers<[1], [0], [0], [1], [0, 0, 1, 1], [], []>} : vector<8x32xbf16>, vector<32x64xbf16>, vector<8x64xf32> -> vector<8x64xf32>
    %c0_3 = arith.constant 0 : index
    %c0_4 = arith.constant 0 : index
    %3 = vector.load %arg3[%c0_3, %c0_4] : memref<1x64xf32, #tpu.memory_space<vmem>>, vector<1x64xf32>
    %4 = vector.broadcast %3 : vector<1x64xf32> to vector<8x64xf32>
    %5 = arith.addf %2, %4 : vector<8x64xf32>
    %cst_5 = arith.constant 0.000000e+00 : f32
    %6 = vector.broadcast %cst_5 : f32 to vector<8x64xf32>
    %7 = arith.maximumf %5, %6 : vector<8x64xf32>
    %8 = arith.truncf %7 : vector<8x64xf32> to vector<8x64xbf16>
    %c0_6 = arith.constant 0 : index
    %c0_7 = arith.constant 0 : index
    %9 = vector.load %arg4[%c0_6, %c0_7] : memref<64x16xbf16, #tpu.memory_space<vmem>>, vector<64x16xbf16>
    %cst_8 = arith.constant dense<0.000000e+00> : vector<8x16xf32>
    %10 = tpu.matmul %8, %9, %cst_8 {dimension_numbers = #tpu.dot_dimension_numbers<[1], [0], [0], [1], [0, 0, 1, 1], [], []>} : vector<8x64xbf16>, vector<64x16xbf16>, vector<8x16xf32> -> vector<8x16xf32>
    %c0_9 = arith.constant 0 : index
    %c0_10 = arith.constant 0 : index
    %11 = vector.load %arg5[%c0_9, %c0_10] : memref<1x16xf32, #tpu.memory_space<vmem>>, vector<1x16xf32>
    %12 = vector.broadcast %11 : vector<1x16xf32> to vector<8x16xf32>
    %13 = arith.addf %10, %12 : vector<8x16xf32>
    %cst_11 = arith.constant 0.000000e+00 : f32
    %14 = vector.broadcast %cst_11 : f32 to vector<8x16xf32>
    %15 = arith.maximumf %13, %14 : vector<8x16xf32>
    %c0_12 = arith.constant 0 : index
    %c0_13 = arith.constant 0 : index
    %16 = vector.load %arg6[%c0_12, %c0_13] : memref<8x16xf32, #tpu.memory_space<vmem>>, vector<8x16xf32>
    tpu.vector_store %arg6[%c0_12, %c0_13], %15 {strides = array<i32>} : memref<8x16xf32, #tpu.memory_space<vmem>>, vector<8x16xf32>,
    return
  }
  func.func @transform_0(%arg0: i32) -> (i32, i32) {
    %c0_i32 = arith.constant 0 : i32
    %c0_i32_0 = arith.constant 0 : i32
    return %arg0, %c0_i32 : i32, i32
  }
  func.func @transform_1(%arg0: i32) -> (i32, i32) {
    %c0_i32 = arith.constant 0 : i32
    %c0_i32_0 = arith.constant 0 : i32
    %c0_i32_1 = arith.constant 0 : i32
    return %c0_i32, %c0_i32_0 : i32, i32
  }
  func.func @transform_2(%arg0: i32) -> (i32, i32) {
    %c0_i32 = arith.constant 0 : i32
    %c0_i32_0 = arith.constant 0 : i32
    %c0_i32_1 = arith.constant 0 : i32
    return %c0_i32, %c0_i32_0 : i32, i32
  }
  func.func @transform_3(%arg0: i32) -> (i32, i32) {
    %c0_i32 = arith.constant 0 : i32
    %c0_i32_0 = arith.constant 0 : i32
    %c0_i32_1 = arith.constant 0 : i32
    return %c0_i32, %c0_i32_0 : i32, i32
  }
  func.func @transform_4(%arg0: i32) -> (i32, i32) {
    %c0_i32 = arith.constant 0 : i32
    %c0_i32_0 = arith.constant 0 : i32
    %c0_i32_1 = arith.constant 0 : i32
    return %c0_i32, %c0_i32_0 : i32, i32
  }
  func.func @transform_5(%arg0: i32) -> (i32, i32) {
    %c0_i32 = arith.constant 0 : i32
    %c0_i32_0 = arith.constant 0 : i32
    return %arg0, %c0_i32 : i32, i32
  }
}

</mosaic_0001>

<bundles_post_ra>
// kernel: mlp_forward.1
= control target key start
LH: loop header
LB: loop body
LE: loop exit
PB: predicated region body
PF: predicated region fallthrough
CT: control target
= control target key end

     0   :  { %s256_s0 = inlined_call_operand.vmem [shape: bf16[8,32], index: 0, kind: input, shape index: {}]   ;;  %s257_s1 = inlined_call_operand.vmem [shape: bf16[32,64], index: 1, kind: input, shape index: {}]   ;;  %s258_s2 = inlined_call_operand.vmem [shape: f32[1,64], index: 2, kind: input, shape index: {}]   ;;  %s259_s3 = inlined_call_operand.vmem [shape: bf16[64,16], index: 3, kind: input, shape index: {}]   ;;  %s260_s4 = inlined_call_operand.vmem [shape: f32[1,16], index: 4, kind: input, shape index: {}]   ;;  %s261_s5 = inlined_call_operand.hbm [shape: f32[8,16], index: 5, kind: output, shape index: {}]  }
   0x1   :  { %v161_v0 = vld [vmem:[%s257_s1 + $0x8] sm:$0xff]  ;;  %v165_v1 = vld [vmem:[%s259_s3 + $0x18] sm:$0xff]  ;;  %v160_v2 = vld [vmem:[%s257_s1] sm:$0xff] }
   0x2   :  { %53 = vmatpush.bf16.msra.mxu0 %v161_v0 }
   0x3   :  { %10 = vsyncpa [#allocation3], 0  ;;  %106 = vmatpush.bf16.msra.mxu1 %v165_v1  ;;  %v164_v3 = vld [vmem:[%s259_s3 + $0x10] sm:$0xff]  ;;  %v22_v4 = vld [vmem:[%s256_s0] sm:$0xf]  ;;  %vm43_vm0 = vcmask 261120  }
   0x4   :  { %v163_v5 = vld [vmem:[%s259_s3 + $0x8] sm:$0xff]  ;;  %v162_v6 = vld [vmem:[%s259_s3] sm:$0xff]  ;;  %vm98_vm1 = vcmask 523264   ;;  %s195_s9 = smov [#allocation2]   ;;  %s125_s12 = sshll.u32 %s261_s5, 4  ;;  %vm116_vm2 = vcmask 130048   ;;  %s126_s12 = int_to_ptr.hbm [resolvable:$true] %s125_s12 }
   0x5   :  { %v167_v7 = vld [vmem:[%s258_s2] ss:$0 sm:$0xff]  ;;  %s123_s10 = sshll.u32 %s195_s9, 4  ;;  %s124_s10 = int_to_ptr.vmem [resolvable:$true] %s123_s10 }
   0x6   :  { %54 = vmatpush.bf16.msra.mxu0 %v160_v2  ;;  %v168_v13 = vld [vmem:[%s260_s4] ss:$0 sm:$0xff] }
   0x7   :  { %107 = vmatpush.bf16.msra.mxu1 %v164_v3 }
   0x9   :  { %142 = vmatmul.msk.bf16.vlgmr.msra.gmra.mxu0 %vm43_vm0, %v22_v4 }
   0xb   :  { %108 = vmatpush.bf16.msra.mxu1 %v163_v5 }
   0xf   :  { %109 = vmatpush.bf16.msra.mxu1 %v162_v6 }
  0x86   :  { %v56_v8 = vpop.f32.mrf.mxu0 }
  0x87   :  { %v57_v9 = vadd.f32 %v167_v7, %v56_v8 }
  0x89   :  { %v60_v10 = vmax.f32 %v57_v9, 0.0 }
  0x8b   :  { %v61_v11 = vpack.c.bf16 %v60_v10, %v60_v10 }
  0x8d   :  { %159 = vmatmul.msk.bf16.vlgmr.msra.gmra.mxu1 %vm98_vm1, %v61_v11 }
  0x8e   :  { %v58_v12 = vpop.f32.mrf.mxu0 }
 0x10a   :  { %v111_v14 = vpop.f32.mrf.mxu1 }
 0x10b   :  { %v112_v15 = vadd.f32 %v168_v13, %v111_v14 }
 0x10d   :  { %v115_v16 = vmax.f32 %v112_v15, 0.0 }
 0x10f   :  { %117 = vst.msk [vmem:[#allocation2] sm:$0xff] %vm116_vm2, %v115_v16 }
 0x110   :  { %128 = dma.vmem_to_hbm [thread:$0]  %s124_s10, 128, %s126_s12, [#allocation3]  }
 0x112   :  { %v113_v17 = vpop.f32.mrf.mxu1 }
 0x113   :  { %193 = dma.done.wait [#allocation3], 128  }
 0x114   :  { %194 = vsyncadd [#allocation3], 4294967168 }
 0x115   :  { %133 = vsyncpa [#allocation3], 1 }

</bundles_post_ra>
